<compile_context>
chip_gen: v7x
topology: tpu7x:2x2x1
jax: 0.10.0
libtpu: 0.0.40
codegen_flags: <defaults>
</compile_context>

<pallas_src>
import functools
import math

import jax
import jax.numpy as jnp
from jax.experimental import pallas as pl
from jax.experimental.pallas import tpu as pltpu


def _cdiv(a, b):
    return -(-a // b)


def _round_up(a, b):
    return (a + b - 1) // b * b


# ----------------------------- Pallas kernel --------------------------------


def _gemm_bn_act_kernel(p_ref, w_ref, sb_ref, o_ref, *, act, neg_slope):
    """One (m-tile, cout-tile) grid step: out = act(patches @ W * scale + bias).

    p_ref:  (TM, KKC)       bf16 im2col patch rows
    w_ref:  (CO, KKC, TCO)  bf16 resident weight slab (all C_out lane tiles)
    sb_ref: (CO, 2, TCO)    f32  resident folded-BN [scale; bias]
    o_ref:  (TM, TCO)       bf16 output tile
    """
    co = pl.program_id(1)

    # Single MXU contraction over the full K*K*C_in depth; f32 accumulation
    # stays inside the matmul (no explicit VMEM accumulator round trips).
    y = jnp.dot(p_ref[...], w_ref[co], preferred_element_type=jnp.float32)

    sb = sb_ref[co]                              # (2, TCO) f32
    y = y * sb[0:1, :] + sb[1:2, :]              # folded BatchNorm (inference)

    if act == 'silu':
        # sigmoid via exp + approx reciprocal: both live on the EUP slot.
        y = y * pl.reciprocal(1.0 + jnp.exp(-y), approx=True)
    elif act == 'relu':
        y = jnp.maximum(y, 0.0)
    elif act == 'lrelu':
        y = jnp.where(y >= 0.0, y, neg_slope * y)

    o_ref[...] = y.astype(o_ref.dtype)           # lane/sublane-dense bf16 store


# --------------------------- tiling heuristics -------------------------------


def _vmem_budget_and_limit():
    """Per-chip VMEM budget for the tile picker and the scoped vmem limit."""
    cap = 64 * 1024 * 1024                       # conservative default (v7x per-TC)
    try:
        cap = int(pltpu.get_tpu_info().vmem_capacity_bytes)
    except Exception:
        pass
    budget = min(cap // 2, 64 * 1024 * 1024)     # v7x: 32 MiB, v5e/v6e: 64 MiB
    limit = min((cap * 3) // 4, 112 * 1024 * 1024)
    return budget, limit


def _tile_vmem_bytes(tm, kkc, co, tco):
    """Layout-aware VMEM footprint: lane dim -> 128, sublanes -> dtype packing."""
    lane = lambda n: _round_up(n, 128)
    s16 = lambda n: _round_up(n, 16)             # bf16 sublane packing
    s8 = lambda n: _round_up(n, 8)               # f32 sublane packing
    patches = 2 * s16(tm) * lane(kkc) * 2        # double-buffered bf16 input tile
    out = 2 * s16(tm) * lane(tco) * 2            # double-buffered bf16 output tile
    wslab = 2 * co * s16(kkc) * lane(tco) * 2    # resident weights (2x: conservative)
    sb = 2 * co * s8(2) * lane(tco) * 4
    acc = s8(tm) * lane(tco) * 4                 # f32 matmul result before bf16 cast
    return patches + out + wslab + sb + acc


def _pick_m_tile(m_total, kkc, co, tco, budget):
    """Largest row tile (multiple of 16) whose working set fits the budget."""
    tm = min(1024, _round_up(max(m_total, 1), 16))
    while tm > 16 and _tile_vmem_bytes(tm, kkc, co, tco) > budget:
        tm = _round_up(tm // 2, 16)
    return max(16, tm)


# ------------------------------- wrapper -------------------------------------


def base_conv_forward(x_nchw, w_oihw, gamma, beta, running_mean, running_var,
                      *, stride=1, eps=1e-5, act='silu', neg_slope=0.1,
                      m_tile=None, return_nhwc=False):
    """Snn_BaseConv forward data path: act(bn(conv(x))).  x_nchw: (N, C_in, H, W).

    neg_slope: LeakyReLU slope; YOLOX convention is 0.1 (PyTorch default 0.01).
    """
    if act not in ('silu', 'relu', 'lrelu'):
        raise AttributeError('Unsupported act type: {}'.format(act))
    N, C_in, H, W = x_nchw.shape
    C_out, C_in_w, K, K2 = w_oihw.shape
    assert C_in_w == C_in and K == K2
    pad = (K - 1) // 2
    H_out = (H + 2 * pad - K) // stride + 1
    W_out = (W + 2 * pad - K) // stride + 1
    KKC = K * K * C_in
    M_total = N * H_out * W_out

    # Output-channel lane tiling: 256 fills the v6e/v7x MXU width, else 128.
    C_out_p = _round_up(C_out, 128)
    TCO = 256 if C_out_p % 256 == 0 else 128
    CO = C_out_p // TCO

    # ---- glue (plain JAX): bf16 NHWC + im2col (taps folded into minor dim) ----
    x_nhwc = jnp.transpose(x_nchw, (0, 2, 3, 1)).astype(jnp.bfloat16)
    x_p = jnp.pad(x_nhwc, ((0, 0), (pad, pad), (pad, pad), (0, 0)))
    taps = []
    for kh in range(K):
        for kw in range(K):
            taps.append(x_p[:, kh:kh + stride * (H_out - 1) + 1:stride,
                              kw:kw + stride * (W_out - 1) + 1:stride, :])
    patches = jnp.concatenate(taps, axis=-1) if len(taps) > 1 else taps[0]
    patches = patches.reshape(M_total, KKC)      # (N*H_out*W_out, K*K*C_in)

    # ---- tiling over the flattened output rows ----
    budget, vmem_limit = _vmem_budget_and_limit()
    if m_tile is None:
        TM = _pick_m_tile(M_total, KKC, CO, TCO, budget)
        TM = min(TM, _round_up(M_total, 16))
        M_tiles = _cdiv(M_total, TM)
        if M_tiles * CO == 1 and M_total >= 32:
            # Guarantee >= 2 parallel grid steps so a v7x megacore can shard.
            TM = _round_up((M_total + 1) // 2, 16)
            M_tiles = _cdiv(M_total, TM)
    else:
        TM = max(16, _round_up(min(m_tile, _round_up(M_total, 16)), 16))
        M_tiles = _cdiv(M_total, TM)
    M_pad = M_tiles * TM
    patches = jnp.pad(patches, ((0, M_pad - M_total), (0, 0)))

    # ---- weights reordered to the patch tap order; folded-BN scale/bias ----
    # TODO(synk): for very large K*K*C_in*C_out weight slabs that exceed the
    # VMEM budget a per-co weight BlockSpec (co-outer grid) would be needed.
    w_2d = jnp.transpose(w_oihw, (2, 3, 1, 0)).reshape(KKC, C_out)
    w_2d = jnp.pad(w_2d.astype(jnp.bfloat16), ((0, 0), (0, C_out_p - C_out)))
    w_slab = jnp.transpose(w_2d.reshape(KKC, CO, TCO), (1, 0, 2))  # (CO, KKC, TCO)

    scale = (gamma.astype(jnp.float32) /
             jnp.sqrt(running_var.astype(jnp.float32) + eps))
    bias = beta.astype(jnp.float32) - running_mean.astype(jnp.float32) * scale
    scale_p = jnp.pad(scale, (0, C_out_p - C_out)).reshape(CO, TCO)
    bias_p = jnp.pad(bias, (0, C_out_p - C_out)).reshape(CO, TCO)
    sb = jnp.stack([scale_p, bias_p], axis=1)                      # (CO, 2, TCO)

    kernel = functools.partial(_gemm_bn_act_kernel, act=act, neg_slope=neg_slope)

    out_p = pl.pallas_call(
        kernel,
        out_shape=jax.ShapeDtypeStruct((M_pad, C_out_p), jnp.bfloat16),
        grid_spec=pltpu.PrefetchScalarGridSpec(
            num_scalar_prefetch=0,
            grid=(M_tiles, CO),                  # co innermost: patch re-DMA skipped
            in_specs=[
                pl.BlockSpec((TM, KKC), lambda m, co: (m, 0)),
                # Constant index_maps -> weights / scale-bias DMA'd once, resident.
                pl.BlockSpec((CO, KKC, TCO), lambda m, co: (0, 0, 0)),
                pl.BlockSpec((CO, 2, TCO), lambda m, co: (0, 0, 0)),
            ],
            out_specs=pl.BlockSpec((TM, TCO), lambda m, co: (m, co)),
        ),
        compiler_params=pltpu.CompilerParams(
            dimension_semantics=("parallel", "parallel"),
            vmem_limit_bytes=vmem_limit),
    )(patches, w_slab, sb)

    out = out_p[:M_total, :C_out].reshape(N, H_out, W_out, C_out)
    if return_nhwc:
        return out                               # stay NHWC/bf16 when chaining blocks
    return jnp.transpose(out, (0, 3, 1, 2)).astype(x_nchw.dtype)


# ------------------------------- reference -----------------------------------


def _reference(x_nchw, w_oihw, gamma, beta, mean, var, *, stride, eps=1e-5):
    # Reference uses the same bf16-quantized inputs (f32 accumulation) so the
    # comparison isolates kernel error from input quantization.
    xq = x_nchw.astype(jnp.bfloat16).astype(jnp.float32)
    wq = w_oihw.astype(jnp.bfloat16).astype(jnp.float32)
    pad = (w_oihw.shape[2] - 1) // 2
    y = jax.lax.conv_general_dilated(
        xq, wq, (stride, stride), [(pad, pad), (pad, pad)],
        dimension_numbers=('NCHW', 'OIHW', 'NCHW'))
    scale = gamma / jnp.sqrt(var + eps)
    bias = beta - mean * scale
    y = y * scale[None, :, None, None] + bias[None, :, None, None]
    return y * jax.nn.sigmoid(y)


if __name__ == "__main__":
    key = jax.random.PRNGKey(0)

    def make_inputs(k, N, C_in, H, W, C_out, ksize):
        k_x, k_w, k_g, k_b, k_m, k_v = jax.random.split(k, 6)
        x = jax.random.normal(k_x, (N, C_in, H, W), dtype=jnp.float32)
        fan_in = C_in * ksize * ksize
        bound = 1.0 / math.sqrt(fan_in)
        w = jax.random.uniform(k_w, (C_out, C_in, ksize, ksize),
                               minval=-bound, maxval=bound, dtype=jnp.float32)
        gamma = jax.random.uniform(k_g, (C_out,), minval=0.5, maxval=1.5)
        beta = jax.random.normal(k_b, (C_out,)) * 0.1
        mean = jax.random.normal(k_m, (C_out,)) * 0.1
        var = jax.random.uniform(k_v, (C_out,), minval=0.5, maxval=1.5)
        return x, w, gamma, beta, mean, var

    configs = [
        # (N, C_in, H, W, C_out, ksize, stride, m_tile)
        (2, 4, 16, 16, 8, 3, 1, None),    # BaseConv(4, 8, 3, 1), auto tiling
        (2, 4, 16, 16, 8, 3, 1, 128),     # forced 4 M-tiles
        (2, 8, 16, 16, 16, 1, 1, None),   # 1x1 conv
        (1, 8, 8, 8, 160, 3, 1, None),    # C_out_p = 256 -> TCO = 256 path
        (1, 8, 16, 16, 320, 3, 2, None),  # stride 2, C_out_p = 384 -> CO = 3
    ]
    keys = jax.random.split(key, len(configs))
    for cfg, k in zip(configs, keys):
        N, C_in, H, W, C_out, ksize, stride, m_tile = cfg
        x, w, gamma, beta, mean, var = make_inputs(k, N, C_in, H, W, C_out, ksize)
        out = base_conv_forward(x, w, gamma, beta, mean, var,
                                stride=stride, act='silu', m_tile=m_tile)
        out = jax.block_until_ready(out)
        ref = _reference(x, w, gamma, beta, mean, var, stride=stride)
        assert out.shape == ref.shape, (cfg, out.shape, ref.shape)
        out_f32 = out.astype(jnp.float32)
        max_err = float(jnp.max(jnp.abs(out_f32 - ref)))
        assert jnp.allclose(out_f32, ref, atol=2.5e-2, rtol=2.5e-2), (cfg, max_err)

    print("KERNEL_OK")
</pallas_src>

<mosaic_0001>
module attributes {stable_mosaic.version = 11 : i64} {
  func.func @_gemm_bn_act_kernel(%arg0: i32, %arg1: i32, %arg2: memref<256x36xbf16, #tpu.memory_space<vmem>>, %arg3: memref<1x36x128xbf16, #tpu.memory_space<vmem>>, %arg4: memref<1x2x128xf32, #tpu.memory_space<vmem>>, %arg5: memref<256x128xbf16, #tpu.memory_space<vmem>>) attributes {dimension_semantics = [#tpu.dimension_semantics<parallel>, #tpu.dimension_semantics<parallel>], iteration_bounds = array<i64: 2, 1>, scalar_prefetch = 0 : i64, scratch_operands = 0 : i64, tpu.core_type = #tpu.core_type<tc>, window_params = [{transform_indices = @transform_0, window_bounds = array<i64: 256, 36>}, {pipeline_mode = #tpu.pipeline_mode<synchronous>, transform_indices = @transform_1, window_bounds = array<i64: 1, 36, 128>}, {pipeline_mode = #tpu.pipeline_mode<synchronous>, transform_indices = @transform_2, window_bounds = array<i64: 1, 2, 128>}, {transform_indices = @transform_3, window_bounds = array<i64: 256, 128>}]} {
    %c0 = arith.constant 0 : index
    %c0_0 = arith.constant 0 : index
    %0 = vector.load %arg2[%c0, %c0_0] : memref<256x36xbf16, #tpu.memory_space<vmem>>, vector<256x36xbf16>
    %1 = arith.index_cast %arg1 : i32 to index
    %c0_1 = arith.constant 0 : index
    %c0_2 = arith.constant 0 : index
    %2 = vector.load %arg3[%1, %c0_1, %c0_2] : memref<1x36x128xbf16, #tpu.memory_space<vmem>>, vector<1x36x128xbf16>
    %3 = vector.shape_cast %2 : vector<1x36x128xbf16> to vector<36x128xbf16>
    %cst = arith.constant dense<0.000000e+00> : vector<256x128xf32>
    %4 = tpu.matmul %0, %3, %cst {dimension_numbers = #tpu.dot_dimension_numbers<[1], [0], [0], [1], [0, 0, 1, 1], [], []>} : vector<256x36xbf16>, vector<36x128xbf16>, vector<256x128xf32> -> vector<256x128xf32>
    %5 = arith.index_cast %arg1 : i32 to index
    %c0_3 = arith.constant 0 : index
    %c0_4 = arith.constant 0 : index
    %6 = vector.load %arg4[%5, %c0_3, %c0_4] : memref<1x2x128xf32, #tpu.memory_space<vmem>>, vector<1x2x128xf32>
    %7 = vector.shape_cast %6 : vector<1x2x128xf32> to vector<2x128xf32>
    %8 = vector.extract_strided_slice %7 {offsets = [0, 0], sizes = [1, 128], strides = [1, 1]} : vector<2x128xf32> to vector<1x128xf32>
    %9 = vector.broadcast %8 : vector<1x128xf32> to vector<256x128xf32>
    %10 = arith.mulf %4, %9 : vector<256x128xf32>
    %11 = vector.extract_strided_slice %7 {offsets = [1, 0], sizes = [1, 128], strides = [1, 1]} : vector<2x128xf32> to vector<1x128xf32>
    %12 = vector.broadcast %11 : vector<1x128xf32> to vector<256x128xf32>
    %13 = arith.addf %10, %12 : vector<256x128xf32>
    %cst_5 = arith.constant 0.000000e+00 : f32
    %14 = vector.broadcast %cst_5 : f32 to vector<256x128xf32>
    %15 = arith.subf %14, %13 : vector<256x128xf32>
    %16 = math.exp %15 : vector<256x128xf32>
    %cst_6 = arith.constant 1.000000e+00 : f32
    %17 = vector.broadcast %cst_6 : f32 to vector<256x128xf32>
    %18 = arith.addf %17, %16 : vector<256x128xf32>
    %19 = tpu.reciprocal %18 {approx = true} : vector<256x128xf32> -> vector<256x128xf32>
    %20 = arith.mulf %13, %19 : vector<256x128xf32>
    %21 = arith.truncf %20 : vector<256x128xf32> to vector<256x128xbf16>
    %c0_7 = arith.constant 0 : index
    %c0_8 = arith.constant 0 : index
    %22 = vector.load %arg5[%c0_7, %c0_8] : memref<256x128xbf16, #tpu.memory_space<vmem>>, vector<256x128xbf16>
    tpu.vector_store %arg5[%c0_7, %c0_8], %21 {strides = array<i32>} : memref<256x128xbf16, #tpu.memory_space<vmem>>, vector<256x128xbf16>,
    return
  }
  func.func @transform_0(%arg0: i32, %arg1: i32) -> (i32, i32) {
    %c0_i32 = arith.constant 0 : i32
    %c0_i32_0 = arith.constant 0 : i32
    return %arg0, %c0_i32 : i32, i32
  }
  func.func @transform_1(%arg0: i32, %arg1: i32) -> (i32, i32, i32) {
    %c0_i32 = arith.constant 0 : i32
    %c0_i32_0 = arith.constant 0 : i32
    %c0_i32_1 = arith.constant 0 : i32
    %c0_i32_2 = arith.constant 0 : i32
    return %c0_i32, %c0_i32_0, %c0_i32_1 : i32, i32, i32
  }
  func.func @transform_2(%arg0: i32, %arg1: i32) -> (i32, i32, i32) {
    %c0_i32 = arith.constant 0 : i32
    %c0_i32_0 = arith.constant 0 : i32
    %c0_i32_1 = arith.constant 0 : i32
    %c0_i32_2 = arith.constant 0 : i32
    return %c0_i32, %c0_i32_0, %c0_i32_1 : i32, i32, i32
  }
  func.func @transform_3(%arg0: i32, %arg1: i32) -> (i32, i32) {
    %c0_i32 = arith.constant 0 : i32
    return %arg0, %arg1 : i32, i32
  }
}

</mosaic_0001>

<bundles_post_ra>
// kernel: tpu_custom_call.1
= control target key start
LH: loop header
LB: loop body
LE: loop exit
PB: predicated region body
PF: predicated region fallthrough
CT: control target
= control target key end

     0   :  { %8 = vsyncpa [#allocation3], 0  ;;  %s2052_s0 = inlined_call_operand.vmem [shape: bf16[512,36], index: 0, kind: input, shape index: {}]   ;;  %s2053_s1 = inlined_call_operand.vmem [shape: bf16[1,36,128], index: 1, kind: input, shape index: {}]   ;;  %s2054_s2 = inlined_call_operand.vmem [shape: f32[1,2,128], index: 2, kind: input, shape index: {}]   ;;  %s2055_s3 = inlined_call_operand.hbm [shape: bf16[512,128], index: 3, kind: output, shape index: {}]  }
   0x1   :  { %10 = vsyncpa [#allocation3 + $0x1], 0  ;;  %s1634_s12 = smov 0   ;;  %s1636_s13 = smov 0  }
   0x2   :  { %s1638_s14 = smov 0   ;;  %s1640_s15 = smov 0  }
   0x3   :  { %s1642_s16 = smov 0   ;;  %s1644_s17 = smov 0  }
   0x4 LB: > { %s1054_s18 = sadd.s32 4294967295, %s1609_s17   ;;  %s1055_s19 = sadd.s32 4294967294, %s1609_s17   ;;  %s1609_s17 = sphi %s1644_s17, %s16_s17   ;;  %s1605_s16 = sphi %s1642_s16, %s2062_s16   ;;  %s1601_s15 = sphi %s1640_s15, %s2061_s15   ;;  %s1597_s14 = sphi %s1638_s14, %s2060_s14   ;;  %s1593_s13 = sphi %s1636_s13, %s2059_s13   ;;  %s1589_s12 = sphi %s1634_s12, %s2058_s12  }
   0x5   : > { %s28_s20 = sadd.s32 1, %s1605_s16  ;;  %s105_s21 = sadd.s32 1, %s1597_s14 }
   0x6   : > { %p30_p0 = scmp.ge.s32.totalorder %s28_s20, 2  ;;  %p115_p1 = scmp.ne.s32.totalorder %s1597_s14, %s1593_s13 }
   0x7   : > { %p116_p2 = scmp.eq.s32.totalorder %s1054_s18, 1  ;;  %p121_p3 = scmp.ne.s32.totalorder %s1593_s13, %s1589_s12 }
   0x8   : > { %s2064_s20 = smov (%p30_p0, %s28_s20), 0  ;;  %p122_p5 = scmp.eq.s32.totalorder %s1055_s19, 1 }
   0x9   : > { %p1674_p4 = por %p116_p2, %p115_p1  ;;  %s100_s23 = ssub.s32 %s1605_s16, %s2064_s20 }
   0xa   : > { %p1058_p6 = scmp.ge.s32.totalorder %s1609_s17, 1  ;;  %p103_p7 = scmp.eq.s32.totalorder %s100_s23, 0 }
   0xb   : > { %p1681_p8 = por %p122_p5, %p121_p3  ;;  %p155_p9 = scmp.lt.s32.totalorder %s1609_s17, 3 }
   0xc   : > { %s1687_s25 = scalar_select %p103_p7, %s1597_s14, %s105_s21  }
   0xd   : > { %p156_p10 = pnand %p1058_p6, %p155_p9 }
   0xe   : > { %v1384_v0 = vld [vmem:[%s2053_s1] sm:$0xff] (!%p156_p10)   ;;  %v1385_v1 = vld [vmem:[%s2053_s1 + $0x8] sm:$0xff] (!%p156_p10)   ;;  %s1060_s30 = sshll.u32 (!%p156_p10), %s1601_s15, 5  ;;  %v1386_v2 = vld [vmem:[%s2053_s1 + $0x10] ss:$0 sps:$4 sm:$0x33] (!%p156_p10)   ;;  %v539_v20 = vlaneseq (!%p156_p10) }
   0xf   : > { %159 = sbr.rel (%p156_p10) target bundleno = 348 (0x15c), region = 32  ;;  %1281 = vmatprep.subr.bf16.mxu0 (!%p156_p10), %v1384_v0  ;;  %1319 = vmatprep.subr.bf16.mxu1 (!%p156_p10), %v1384_v0  ;;  %p180_p11 = scmp.lt.s32.totalorder (!%p156_p10), %s1060_s30, 63  ;;  %vm371_vm0 = vcmask (!%p156_p10), 1041408   ;;  %vm322_vm1 = vcmask (!%p156_p10), 293888   ;;  %v538_v23 = vld [vmem:[%s2054_s2] sm:$0x3] (!%p156_p10) }
  0x10   : > { %1282 = vmatpush3.bf16.msra.mxu0 (!%p156_p10), %v1384_v0  ;;  %1322 = vmatpush3.bf16.msra.mxu1 (!%p156_p10), %v1384_v0  ;;  %v373_v3 = vsel (!%p156_p10), %vm371_vm0, %v1386_v2, 0  ;;  %v540_v21 = vshrl.u32 (!%p156_p10), %v539_v20, 7  ;;  %s176_s18 = sand.u32 (!%p156_p10), 1, %s1593_s13   ;;  %s1166_s23 = sshll.u32 (!%p156_p10), %s1601_s15, 11 }
  0x11   : > { %1283 = vmatprep.subr.bf16.mxu0 (!%p156_p10), %v1385_v1  ;;  %1320 = vmatprep.subr.bf16.mxu1 (!%p156_p10), %v1385_v1  ;;  %s1881_s19 = sshll.u32 (!%p156_p10), %s176_s18, 7  ;;  %s1997_s15 = scalar_lea.hbm (!%p156_p10), %s2055_s3, %s1166_s23 }
  0x12   : > { %v541_v22 = vsub.s32 (!%p156_p10), 0, %v540_v21  ;;  %v577_v24 = vsub.s32 (!%p156_p10), 1, %v540_v21  ;;  %s1904_s21 = scalar_lea.vmem (!%p156_p10), [#allocation2], %s1881_s19  ;;  %s2006_s29 = scalar_lea.sflag (!%p156_p10), [#allocation3], %s176_s18 }
  0x13   : > { %s978_s26 = sshll.u32 (!%p156_p10), %s1904_s21, 4  ;;  %s1611_s4 = smov (!%p156_p10), [#allocation2]   ;;  %s1999_s26 = int_to_ptr.vmem [resolvable:$true] %s978_s26 }
  0x14   : > { %1284 = vmatpush3.bf16.msra.mxu0 (!%p156_p10), %v1385_v1  ;;  %1323 = vmatpush3.bf16.msra.mxu1 (!%p156_p10), %v1385_v1  ;;  %v1739_v25 = vrot.slane (!%p156_p10), %v538_v23, %v541_v22  ;;  %v1741_v26 = vrot.slane (!%p156_p10), %v538_v23, %v577_v24  ;;  %s1535_s5 = sshll.u32 (!%p156_p10), %s1611_s4, 4  ;;  %s1536_s5 = int_to_ptr.vmem [resolvable:$false] %s1535_s5 }
  0x15   : > { %1325 = vmatprep.subr.msk.bf16.mxu0 (!%p156_p10), %vm371_vm0, %v1386_v2  ;;  %1326 = vmatprep.subr.msk.bf16.mxu1 (!%p156_p10), %vm371_vm0, %v1386_v2  ;;  %p1538_p1 = scmp.lt.s32.totalorder (!%p156_p10), %s1999_s26, %s1536_s5 }
  0x16   : > { %s2066_s30 = smov (!%p180_p11, %s1060_s30), 63 }
  0x17   : > { %s1061_s6 = sshll.u32 %s2066_s30, 2  ;;  %s1531_s30 = scalar_lea.vmem %s1999_s26, 2048 }
  0x18   : > { %s1702_s9 = scalar_lea.vmem %s2052_s0, %s1061_s6  ;;  %1286 = vmatpush3.bf16.msra.mxu0 %v373_v3  ;;  %1324 = vmatpush3.bf16.msra.mxu1 %v373_v3  ;;  %p1532_p12 = scmp.ne.s32.totalorder %s1999_s26, %s1531_s30 }
  0x19   : > { %v1387_v4 = vld [vmem:[%s1702_s9] sm:$0xff]   ;;  %v1389_v6 = vld [vmem:[%s1702_s9 + $0x8] sm:$0xff]   ;;  %v1391_v8 = vld [vmem:[%s1702_s9 + $0x10] sm:$0xff]   ;;  %s1537_s6 = scalar_lea.vmem %s1536_s5, 4096 }
  0x1a   : > { %v1388_v5 = vld [vmem:[%s1702_s9 + $0x40] sm:$0xff]   ;;  %1287 = vmatprep.mubr.msk.bf16.mxu0 %vm322_vm1, %v1387_v4  ;;  %v1390_v7 = vld [vmem:[%s1702_s9 + $0x48] sm:$0xff]   ;;  %v1392_v9 = vld [vmem:[%s1702_s9 + $0x50] sm:$0xff]   ;;  %p1533_p13 = pnand %p1532_p12, %p1674_p4  ;;  %p1539_p2 = scmp.lt.s32.totalorder %s1537_s6, %s1531_s30 }
  0x1b   : > { %1303 = vmatprep.mubr.msk.bf16.mxu1 %vm322_vm1, %v1388_v5  ;;  %1288 = vmatmul.mubr.msk.bf16.vlgmr.msra.gmra.mrb[0].mxu0 %vm322_vm1, %v1389_v6  ;;  %v1393_v10 = vld [vmem:[%s1702_s9 + $0x18] sm:$0xff]   ;;  %v1395_v12 = vld [vmem:[%s1702_s9 + $0x20] sm:$0xff]   ;;  %v1397_v14 = vld [vmem:[%s1702_s9 + $0x28] sm:$0xff]  }
  0x1c   : > { %1304 = vmatmul.mubr.msk.bf16.vlgmr.msra.gmra.mrb[0].mxu1 %vm322_vm1, %v1390_v7  ;;  %1291 = vmatprep.mubr.msk.bf16.mxu0 %vm322_vm1, %v1391_v8  ;;  %v1394_v11 = vld [vmem:[%s1702_s9 + $0x58] sm:$0xff]   ;;  %v1396_v13 = vld [vmem:[%s1702_s9 + $0x60] sm:$0xff]   ;;  %v1398_v15 = vld [vmem:[%s1702_s9 + $0x68] sm:$0xff]   ;;  %p1534_p0 = pneg %p1533_p13  ;;  %p1540_p3 = por %p1539_p2, %p1538_p1 }
  0x1d   : > { %1307 = vmatprep.mubr.msk.bf16.mxu1 %vm322_vm1, %v1392_v9  ;;  %v1399_v16 = vld [vmem:[%s1702_s9 + $0x30] sm:$0xff]   ;;  %v1401_v18 = vld [vmem:[%s1702_s9 + $0x38] sm:$0xff]  }
  0x1e   : > { %v1400_v17 = vld [vmem:[%s1702_s9 + $0x70] sm:$0xff]   ;;  %v1402_v19 = vld [vmem:[%s1702_s9 + $0x78] sm:$0xff]   ;;  %p1541_p5 = pnand %p1540_p3, %p1534_p0 }
  0x23   : > { %1292 = vmatmul.mubr.msk.bf16.gmra.mrb[4].mxu0 %vm322_vm1, %v1393_v10 }
  0x24   : > { %1308 = vmatmul.mubr.msk.bf16.gmra.mrb[4].mxu1 %vm322_vm1, %v1394_v11  ;;  %1295 = vmatprep.mubr.msk.bf16.mxu0 %vm322_vm1, %v1395_v12 }
  0x25   : > { %1311 = vmatprep.mubr.msk.bf16.mxu1 %vm322_vm1, %v1396_v13 }
  0x2b   : > { %1296 = vmatmul.mubr.msk.bf16.gmra.mrb[8].mxu0 %vm322_vm1, %v1397_v14 }
  0x2c   : > { %1312 = vmatmul.mubr.msk.bf16.gmra.mrb[8].mxu1 %vm322_vm1, %v1398_v15  ;;  %1299 = vmatprep.mubr.msk.bf16.mxu0 %vm322_vm1, %v1399_v16 }
  0x2d   : > { %1315 = vmatprep.mubr.msk.bf16.mxu1 %vm322_vm1, %v1400_v17 }
  0x33   : > { %1300 = vmatmul.mubr.msk.bf16.gmra.mrb[12].mxu0 %vm322_vm1, %v1401_v18 }
  0x34   : > { %1316 = vmatmul.mubr.msk.bf16.gmra.mrb[12].mxu1 %vm322_vm1, %v1402_v19 }
  0xee   : > { %v1289_v27 = vpop.f32.mrb[0].mxu0 }
  0xef   : > { %v1305_v28 = vpop.f32.mrb[0].mxu1  ;;  %v545_v29 = vmul.f32 %v1289_v27, %v1739_v25  ;;  %v409_v31 = vpop.f32.mrb[1].mxu0 }
  0xf0   : > { %v561_v30 = vmul.f32 %v1305_v28, %v1739_v25  ;;  %v473_v32 = vpop.f32.mrb[1].mxu1  ;;  %v543_v33 = vmul.f32 %v1739_v25, %v409_v31  ;;  %v1290_v35 = vpop.f32.mrb[2].mxu0 }
  0xf1   : > { %v559_v34 = vmul.f32 %v1739_v25, %v473_v32  ;;  %v1306_v36 = vpop.f32.mrb[2].mxu1  ;;  %v1748_v37 = vadd.f32 %v1741_v26, %v545_v29  ;;  %v546_v39 = vmul.f32 %v1290_v35, %v1739_v25  ;;  %v412_v41 = vpop.f32.mrb[3].mxu0 }
  0xf2   : > { %v1751_v38 = vadd.f32 %v1741_v26, %v561_v30  ;;  %v562_v40 = vmul.f32 %v1306_v36, %v1739_v25  ;;  %v476_v42 = vpop.f32.mrb[3].mxu1  ;;  %v1756_v43 = vadd.f32 %v1741_v26, %v543_v33  ;;  %v544_v45 = vmul.f32 %v1739_v25, %v412_v41 }
  0xf3   : > { %v1759_v44 = vadd.f32 %v1741_v26, %v559_v34  ;;  %v560_v46 = vmul.f32 %v1739_v25, %v476_v42  ;;  %v613_v47 = vsub.f32 0.0, %v1748_v37  ;;  %v1766_v49 = vadd.f32 %v1741_v26, %v546_v39 }
  0xf4   : > { %v629_v48 = vsub.f32 0.0, %v1751_v38  ;;  %v1769_v50 = vadd.f32 %v1741_v26, %v562_v40  ;;  %v611_v51 = vsub.f32 0.0, %v1756_v43  ;;  %v1774_v53 = vadd.f32 %v1741_v26, %v544_v45 }
  0xf5   : > { %v627_v52 = vsub.f32 0.0, %v1759_v44  ;;  %v1777_v54 = vadd.f32 %v1741_v26, %v560_v46  ;;  %v647_v55 = vmul.f32 1.442695, %v613_v47  ;;  %v614_v57 = vsub.f32 0.0, %v1766_v49 }
  0xf6   : > { %v679_v56 = vmul.f32 1.442695, %v629_v48  ;;  %v630_v58 = vsub.f32 0.0, %v1769_v50  ;;  %v643_v59 = vmul.f32 1.442695, %v611_v51  ;;  %v612_v61 = vsub.f32 0.0, %v1774_v53 }
  0xf7   : > { %v675_v60 = vmul.f32 1.442695, %v627_v52  ;;  %v628_v62 = vsub.f32 0.0, %v1777_v54  ;;  %1403 = vpow2.f32 %v647_v55  ;;  %v649_v63 = vmul.f32 1.442695, %v614_v57  ;;  %v1293_v1 = vpop.f32.mrb[4].mxu0 }
  0xf8   : > { %v681_v0 = vmul.f32 1.442695, %v630_v58  ;;  %v1309_v2 = vpop.f32.mrb[4].mxu1  ;;  %1405 = vpow2.f32 %v679_v56  ;;  %v645_v3 = vmul.f32 1.442695, %v612_v61  ;;  %v549_v5 = vmul.f32 %v1293_v1, %v1739_v25  ;;  %v425_v6 = vpop.f32.mrb[5].mxu0 }
  0xf9   : > { %v677_v4 = vmul.f32 1.442695, %v628_v62  ;;  %v489_v7 = vpop.f32.mrb[5].mxu1  ;;  %1407 = vpow2.f32 %v643_v59  ;;  %v565_v8 = vmul.f32 %v1309_v2, %v1739_v25  ;;  %v547_v9 = vmul.f32 %v1739_v25, %v425_v6  ;;  %v1294_v11 = vpop.f32.mrb[6].mxu0 }
  0xfa   : > { %v563_v10 = vmul.f32 %v1739_v25, %v489_v7  ;;  %v1310_v12 = vpop.f32.mrb[6].mxu1  ;;  %1409 = vpow2.f32 %v675_v60  ;;  %v1788_v13 = vadd.f32 %v1741_v26, %v549_v5  ;;  %v550_v14 = vmul.f32 %v1294_v11, %v1739_v25  ;;  %v428_v16 = vpop.f32.mrb[7].mxu0 }
  0xfb   : > { %v566_v15 = vmul.f32 %v1310_v12, %v1739_v25  ;;  %v492_v17 = vpop.f32.mrb[7].mxu1  ;;  %1411 = vpow2.f32 %v649_v63  ;;  %v1793_v18 = vadd.f32 %v1741_v26, %v565_v8  ;;  %v1796_v19 = vadd.f32 %v1741_v26, %v547_v9 }
  0xfc   : > { %v1799_v20 = vadd.f32 %v1741_v26, %v563_v10  ;;  %1413 = vpow2.f32 %v681_v0  ;;  %v617_v21 = vsub.f32 0.0, %v1788_v13  ;;  %v1803_v22 = vadd.f32 %v1741_v26, %v550_v14 }
  0xfd   : > { %1415 = vpow2.f32 %v645_v3  ;;  %v633_v23 = vsub.f32 0.0, %v1793_v18  ;;  %v615_v24 = vsub.f32 0.0, %v1796_v19  ;;  %v1809_v29 = vadd.f32 %v1741_v26, %v566_v15 }
  0xfe   : > { %v631_v27 = vsub.f32 0.0, %v1799_v20  ;;  %1417 = vpow2.f32 %v677_v4  ;;  %v655_v28 = vmul.f32 1.442695, %v617_v21  ;;  %v1297_v30 = vpop.f32.mrb[8].mxu0  ;;  %v548_v35 = vmul.f32 %v1739_v25, %v428_v16 }
  0xff   : > { %v1313_v31 = vpop.f32.mrb[8].mxu1  ;;  %v687_v32 = vmul.f32 1.442695, %v633_v23  ;;  %v651_v33 = vmul.f32 1.442695, %v615_v24  ;;  %v618_v36 = vsub.f32 0.0, %v1803_v22  ;;  %v564_v39 = vmul.f32 %v1739_v25, %v492_v17 }
 0x100   : > { %v683_v34 = vmul.f32 1.442695, %v631_v27  ;;  %1419 = vpow2.f32 %v655_v28  ;;  %v441_v40 = vpop.f32.mrb[9].mxu0  ;;  %v505_v41 = vpop.f32.mrb[9].mxu1  ;;  %v1815_v45 = vadd.f32 %v1741_v26, %v548_v35  ;;  %v553_v46 = vmul.f32 %v1297_v30, %v1739_v25 }
 0x101   : > { %v1404_v42 = vpop.eup %1403  ;;  %1421 = vpow2.f32 %v687_v32  ;;  %v569_v47 = vmul.f32 %v1313_v31, %v1739_v25  ;;  %v1298_v48 = vpop.f32.mrb[10].mxu0  ;;  %v634_v56 = vsub.f32 0.0, %v1809_v29  ;;  %v1821_v57 = vadd.f32 %v1741_v26, %v564_v39 }
 0x102   : > { %v1314_v51 = vpop.f32.mrb[10].mxu1  ;;  %v1406_v52 = vpop.eup %1405  ;;  %v709_v55 = vadd.f32 1.0, %v1404_v42  ;;  %1423 = vpow2.f32 %v651_v33  ;;  %v616_v62 = vsub.f32 0.0, %v1815_v45  ;;  %v551_v63 = vmul.f32 %v1739_v25, %v441_v40 }
 0x103   : > { %v444_v58 = vpop.f32.mrb[11].mxu0  ;;  %v1823_v59 = vpop.f32.mrb[11].mxu1  ;;  %v725_v61 = vadd.f32 1.0, %v1406_v52  ;;  %1425 = vpow2.f32 %v683_v34  ;;  %v1828_v2 = vadd.f32 %v1741_v26, %v553_v46  ;;  %v657_v5 = vmul.f32 1.442695, %v618_v36 }
 0x104   : > { %v1408_v60 = vpop.eup %1407  ;;  %1427 = vrcp.f32 %v709_v55  ;;  %v1831_v6 = vadd.f32 %v1741_v26, %v569_v47  ;;  %v689_v9 = vmul.f32 1.442695, %v634_v56  ;;  %v632_v10 = vsub.f32 0.0, %v1821_v57 }
 0x105   : > { %v1410_v0 = vpop.eup %1409  ;;  %v707_v1 = vadd.f32 1.0, %v1408_v60  ;;  %1429 = vrcp.f32 %v725_v61  ;;  %v653_v16 = vmul.f32 1.442695, %v616_v62  ;;  %v1839_v17 = vadd.f32 %v1741_v26, %v551_v63 }
 0x106   : > { %v1412_v3 = vpop.eup %1411  ;;  %v723_v4 = vadd.f32 1.0, %v1410_v0  ;;  %v1834_v11 = vpop.f32.mrb[12].mxu0  ;;  %v621_v28 = vsub.f32 0.0, %v1828_v2  ;;  %v567_v30 = vmul.f32 %v1739_v25, %v505_v41  ;;  %v637_v34 = vsub.f32 0.0, %v1831_v6 }
 0x107   : > { %v1414_v7 = vpop.eup %1413  ;;  %1431 = vrcp.f32 %v707_v1  ;;  %v710_v8 = vadd.f32 1.0, %v1412_v3  ;;  %v1836_v12 = vpop.f32.mrb[12].mxu1  ;;  %v554_v35 = vmul.f32 %v1298_v48, %v1739_v25  ;;  %v570_v41 = vmul.f32 %v1314_v51, %v1739_v25 }
 0x108   : > { %v1416_v14 = vpop.eup %1415  ;;  %1433 = vrcp.f32 %v723_v4  ;;  %v726_v15 = vadd.f32 1.0, %v1414_v7  ;;  %v1841_v21 = vpop.f32.mrb[13].mxu0  ;;  %v1858_v42 = vadd.f32 %v1741_v26, %v567_v30  ;;  %v552_v46 = vmul.f32 %v1739_v25, %v444_v58 }
 0x109   : > { %v1843_v23 = vpop.f32.mrb[13].mxu1  ;;  %v1418_v24 = vpop.eup %1417  ;;  %1435 = vrcp.f32 %v710_v8  ;;  %v708_v27 = vadd.f32 1.0, %v1416_v14  ;;  %v619_v55 = vsub.f32 0.0, %v1839_v17  ;;  %v1864_v48 = vadd.f32 %v1741_v26, %v554_v35 }
 0x10a   : > { %v1847_v31 = vpop.f32.mrb[14].mxu0  ;;  %v1849_v32 = vpop.f32.mrb[14].mxu1  ;;  %1437 = vrcp.f32 %v726_v15  ;;  %v724_v33 = vadd.f32 1.0, %v1418_v24  ;;  %v635_v61 = vsub.f32 0.0, %v1858_v42  ;;  %v1868_v62 = vadd.f32 %v1741_v26, %v570_v41 }
 0x10b   : > { %v1853_v36 = vpop.f32.mrb[15].mxu0  ;;  %v1855_v39 = vpop.f32.mrb[15].mxu1  ;;  %1439 = vrcp.f32 %v708_v27  ;;  %v622_v63 = vsub.f32 0.0, %v1864_v48  ;;  %v1872_v0 = vadd.f32 %v1741_v26, %v552_v46  ;;  %v685_v4 = vmul.f32 1.442695, %v632_v10 }
 0x10c   : > { %v1420_v40 = vpop.eup %1419  ;;  %1441 = vrcp.f32 %v724_v33  ;;  %v663_v8 = vmul.f32 1.442695, %v621_v28  ;;  %v695_v14 = vmul.f32 1.442695, %v637_v34  ;;  %v659_v15 = vmul.f32 1.442695, %v619_v55 }
 0x10d   : > { %v1422_v47 = vpop.eup %1421  ;;  %v713_v52 = vadd.f32 1.0, %v1420_v40  ;;  %1443 = vpow2.f32 %v657_v5  ;;  %v638_v5 = vsub.f32 0.0, %v1868_v62  ;;  %v691_v30 = vmul.f32 1.442695, %v635_v61 }
 0x10e   : > { %v1424_v56 = vpop.eup %1423  ;;  %v729_v60 = vadd.f32 1.0, %v1422_v47  ;;  %v568_v33 = vmul.f32 %v1739_v25, %v1823_v59  ;;  %v665_v10 = vmul.f32 1.442695, %v622_v63  ;;  %v620_v40 = vsub.f32 0.0, %v1872_v0 }
 0x10f   : > { %v1426_v51 = vpop.eup %1425  ;;  %1445 = vrcp.f32 %v713_v52  ;;  %v711_v58 = vadd.f32 1.0, %v1424_v56  ;;  %v557_v28 = vmul.f32 %v1834_v11, %v1739_v25 }
 0x110   : > { %v1428_v1 = vpop.eup %1427  ;;  %1447 = vrcp.f32 %v729_v60  ;;  %v727_v3 = vadd.f32 1.0, %v1426_v51  ;;  %v1888_v46 = vadd.f32 %v1741_v26, %v568_v33 }
 0x111   : > { %v1430_v7 = vpop.eup %1429  ;;  %1449 = vrcp.f32 %v711_v58  ;;  %v773_v27 = vmul.f32 %v1428_v1, %v1748_v37  ;;  %v697_v37 = vmul.f32 1.442695, %v638_v5  ;;  %v661_v1 = vmul.f32 1.442695, %v620_v40 }
 0x112   : > { %v1432_v24 = vpop.eup %1431  ;;  %1451 = vrcp.f32 %v727_v3  ;;  %v789_v41 = vmul.f32 %v1430_v7, %v1751_v38 }
 0x113   : > { %v1434_v35 = vpop.eup %1433  ;;  %1453 = vpow2.f32 %v689_v9  ;;  %v771_v47 = vmul.f32 %v1432_v24, %v1756_v43  ;;  %v1893_v9 = vadd.f32 %v1741_v26, %v557_v28 }
 0x114   : > { %v1436_v34 = vpop.eup %1435  ;;  %1455 = vpow2.f32 %v653_v16  ;;  %v787_v11 = vmul.f32 %v1434_v35, %v1759_v44  ;;  %v636_v16 = vsub.f32 0.0, %v1888_v46  ;;  %v573_v44 = vmul.f32 %v1836_v12, %v1739_v25 }
 0x115   : > { %v1438_v59 = vpop.eup %1437  ;;  %v774_v52 = vmul.f32 %v1436_v34, %v1766_v49  ;;  %1457 = vpow2.f32 %v685_v4  ;;  %v625_v43 = vsub.f32 0.0, %v1893_v9 }
 0x116   : > { %v1440_v55 = vpop.eup %1439  ;;  %v790_v38 = vmul.f32 %v1438_v59, %v1769_v50  ;;  %1459 = vpow2.f32 %v663_v8  ;;  %v693_v4 = vmul.f32 1.442695, %v636_v16  ;;  %v1917_v8 = vadd.f32 %v1741_v26, %v573_v44 }
 0x117   : > { %v1442_v56 = vpop.eup %1441  ;;  %v1175_v60 = vpack.c.bf16 %v774_v52, %v773_v27  ;;  %v772_v61 = vmul.f32 %v1440_v55, %v1774_v53  ;;  %1461 = vpow2.f32 %v695_v14  ;;  %v671_v12 = vmul.f32 1.442695, %v625_v43 }
 0x118   : > { %v1444_v49 = vpop.eup %1443  ;;  %v1215_v51 = vpack.c.bf16 %v790_v38, %v789_v41  ;;  %v788_v58 = vmul.f32 %v1442_v56, %v1777_v54  ;;  %1463 = vpow2.f32 %v659_v15  ;;  %v555_v15 = vmul.f32 %v1739_v25, %v1841_v21 }
 0x119   : > { %v1446_v63 = vpop.eup %1445  ;;  %1247 = vst [vmem:[%s1904_s21 + $0x8] sm:$0xff] %v1175_v60   ;;  %v1170_v50 = vpack.c.bf16 %v772_v61, %v771_v47  ;;  %v714_v53 = vadd.f32 1.0, %v1444_v49  ;;  %1465 = vpow2.f32 %v691_v30  ;;  %v571_v30 = vmul.f32 %v1739_v25, %v1843_v23 }
 0x11a   : > { %v1907_v3 = vpop.eup %1447  ;;  %1255 = vst [vmem:[%s1904_s21 + $0x48] sm:$0xff] %v1215_v51   ;;  %v1210_v54 = vpack.c.bf16 %v788_v58, %v787_v11  ;;  %1467 = vpow2.f32 %v665_v10  ;;  %v558_v10 = vmul.f32 %v1847_v31, %v1739_v25  ;;  %v641_v34 = vsub.f32 0.0, %v1917_v8 }
 0x11b   : > { %v1910_v5 = vpop.eup %1449  ;;  %1171 = vst [vmem:[%s1904_s21] sm:$0xff] %v1170_v50   ;;  %1469 = vrcp.f32 %v714_v53  ;;  %v574_v21 = vmul.f32 %v1849_v32, %v1739_v25  ;;  %v1929_v59 = vadd.f32 %v1741_v26, %v555_v15  ;;  %v556_v23 = vmul.f32 %v1739_v25, %v1853_v36 }
 0x11c   : > { %v1913_v7 = vpop.eup %1451  ;;  %1254 = vst [vmem:[%s1904_s21 + $0x40] sm:$0xff] %v1210_v54   ;;  %1471 = vpow2.f32 %v697_v37  ;;  %v777_v31 = vmul.f32 %v1446_v63, %v1788_v13  ;;  %v1935_v55 = vadd.f32 %v1741_v26, %v571_v30  ;;  %v1938_v38 = vadd.f32 %v1741_v26, %v558_v10 }
 0x11d   : > { %v1454_v14 = vpop.eup %1453  ;;  %1473 = vpow2.f32 %v661_v1  ;;  %v572_v16 = vmul.f32 %v1739_v25, %v1855_v39  ;;  %v703_v60 = vmul.f32 1.442695, %v641_v34  ;;  %v1943_v13 = vadd.f32 %v1741_v26, %v574_v21 }
 0x11e   : > { %v1456_v24 = vpop.eup %1455  ;;  %v730_v27 = vadd.f32 1.0, %v1454_v14  ;;  %1475 = vpow2.f32 %v693_v4  ;;  %v623_v49 = vsub.f32 0.0, %v1929_v59  ;;  %v1947_v51 = vadd.f32 %v1741_v26, %v556_v23 }
 0x11f   : > { %v1458_v33 = vpop.eup %1457  ;;  %v712_v35 = vadd.f32 1.0, %v1456_v24  ;;  %1477 = vpow2.f32 %v671_v12  ;;  %v639_v25 = vsub.f32 0.0, %v1935_v55  ;;  %v1952_v39 = vadd.f32 %v1741_v26, %v572_v16 }
 0x120   : > { %v1460_v40 = vpop.eup %1459  ;;  %1479 = vrcp.f32 %v730_v27  ;;  %v728_v28 = vadd.f32 1.0, %v1458_v33  ;;  %v626_v53 = vsub.f32 0.0, %v1938_v38  ;;  %v642_v12 = vsub.f32 0.0, %v1943_v13 }
 0x121   : > { %v1462_v41 = vpop.eup %1461  ;;  %1481 = vrcp.f32 %v712_v35  ;;  %v717_v37 = vadd.f32 1.0, %v1460_v40  ;;  %v667_v15 = vmul.f32 1.442695, %v623_v49  ;;  %v624_v24 = vsub.f32 0.0, %v1947_v51 }
 0x122   : > { %v1464_v47 = vpop.eup %1463  ;;  %1483 = vrcp.f32 %v728_v28  ;;  %v733_v52 = vadd.f32 1.0, %v1462_v41  ;;  %v699_v27 = vmul.f32 1.442695, %v639_v25  ;;  %v640_v30 = vsub.f32 0.0, %v1952_v39 }
 0x123   : > { %v1466_v11 = vpop.eup %1465  ;;  %1485 = vrcp.f32 %v717_v37  ;;  %v715_v32 = vadd.f32 1.0, %v1464_v47  ;;  %v793_v35 = vmul.f32 %v1907_v3, %v1793_v18  ;;  %v673_v40 = vmul.f32 1.442695, %v626_v53 }
 0x124   : > { %v1468_v56 = vpop.eup %1467  ;;  %1487 = vrcp.f32 %v733_v52  ;;  %v731_v36 = vadd.f32 1.0, %v1466_v11  ;;  %v775_v34 = vmul.f32 %v1910_v5, %v1796_v19  ;;  %v791_v21 = vmul.f32 %v1913_v7, %v1799_v20 }
 0x125   : > { %v1470_v61 = vpop.eup %1469  ;;  %1489 = vrcp.f32 %v715_v32  ;;  %v718_v43 = vadd.f32 1.0, %v1468_v56  ;;  %v705_v37 = vmul.f32 1.442695, %v642_v12  ;;  %v701_v52 = vmul.f32 1.442695, %v640_v30 }
 0x126   : > { %v1472_v58 = vpop.eup %1471  ;;  %v778_v44 = vmul.f32 %v1470_v61, %v1803_v22  ;;  %1491 = vrcp.f32 %v731_v36 }
 0x127   : > { %v1474_v63 = vpop.eup %1473  ;;  %1493 = vrcp.f32 %v718_v43  ;;  %v734_v50 = vadd.f32 1.0, %v1472_v58 }
 0x128   : > { %v1476_v1 = vpop.eup %1475  ;;  %v1185_v54 = vpack.c.bf16 %v778_v44, %v777_v31  ;;  %v716_v4 = vadd.f32 1.0, %v1474_v63  ;;  %1495 = vpow2.f32 %v703_v60 }
 0x129   : > { %v1478_v14 = vpop.eup %1477  ;;  %1497 = vrcp.f32 %v734_v50  ;;  %v732_v22 = vadd.f32 1.0, %v1476_v1 }
 0x12a   : > { %v1480_v26 = vpop.eup %1479  ;;  %1249 = vst [vmem:[%s1904_s21 + $0x18] sm:$0xff] %v1185_v54   ;;  %1499 = vrcp.f32 %v716_v4  ;;  %v721_v61 = vadd.f32 1.0, %v1478_v14 }
 0x12b   : > { %v1482_v33 = vpop.eup %1481  ;;  %v794_v10 = vmul.f32 %v1480_v26, %v1809_v29  ;;  %1501 = vrcp.f32 %v732_v22  ;;  %v669_v29 = vmul.f32 1.442695, %v624_v24 }
 0x12c   : > { %v1484_v28 = vpop.eup %1483  ;;  %v776_v41 = vmul.f32 %v1482_v33, %v1815_v45  ;;  %1503 = vpow2.f32 %v667_v15 }
 0x12d   : > { %v1486_v23 = vpop.eup %1485  ;;  %v1225_v47 = vpack.c.bf16 %v794_v10, %v793_v35  ;;  %v792_v18 = vmul.f32 %v1484_v28, %v1821_v57  ;;  %1505 = vpow2.f32 %v699_v27 }
 0x12e   : > { %v1488_v3 = vpop.eup %1487  ;;  %v1180_v31 = vpack.c.bf16 %v776_v41, %v775_v34  ;;  %1507 = vpow2.f32 %v673_v40  ;;  %v781_v57 = vmul.f32 %v1486_v23, %v1828_v2 }
 0x12f   : > { %v1490_v11 = vpop.eup %1489  ;;  %1257 = vst [vmem:[%s1904_s21 + $0x58] sm:$0xff] %v1225_v47   ;;  %v1220_v19 = vpack.c.bf16 %v792_v18, %v791_v21  ;;  %1509 = vpow2.f32 %v705_v37  ;;  %v797_v56 = vmul.f32 %v1488_v3, %v1831_v6 }
 0x130   : > { %v1492_v20 = vpop.eup %1491  ;;  %1248 = vst [vmem:[%s1904_s21 + $0x10] sm:$0xff] %v1180_v31   ;;  %1511 = vpow2.f32 %v669_v29  ;;  %v779_v49 = vmul.f32 %v1490_v11, %v1839_v17 }
 0x131   : > { %v1494_v45 = vpop.eup %1493  ;;  %1256 = vst [vmem:[%s1904_s21 + $0x50] sm:$0xff] %v1220_v19   ;;  %1513 = vpow2.f32 %v701_v52  ;;  %v795_v2 = vmul.f32 %v1492_v20, %v1858_v42 }
 0x132   : > { %v1496_v5 = vpop.eup %1495  ;;  %v782_v7 = vmul.f32 %v1494_v45, %v1864_v48  ;;  %1515 = vrcp.f32 %v721_v61 }
 0x133   : > { %v1498_v32 = vpop.eup %1497  ;;  %v737_v44 = vadd.f32 1.0, %v1496_v5 }
 0x134   : > { %v1500_v16 = vpop.eup %1499  ;;  %v1195_v36 = vpack.c.bf16 %v782_v7, %v781_v57  ;;  %v798_v60 = vmul.f32 %v1498_v32, %v1868_v62 }
 0x135   : > { %v1502_v43 = vpop.eup %1501  ;;  %v780_v58 = vmul.f32 %v1500_v16, %v1872_v0  ;;  %1517 = vrcp.f32 %v737_v44 }
 0x136   : > { %1251 = vst [vmem:[%s1904_s21 + $0x28] sm:$0xff] %v1195_v36   ;;  %v1235_v48 = vpack.c.bf16 %v798_v60, %v797_v56  ;;  %v796_v25 = vmul.f32 %v1502_v43, %v1888_v46  ;;  %v1504_v63 = vpop.eup %1503 }
 0x137   : > { %v1190_v6 = vpack.c.bf16 %v780_v58, %v779_v49  ;;  %v1506_v50 = vpop.eup %1505  ;;  %v719_v53 = vadd.f32 1.0, %v1504_v63 }
 0x138   : > { %1259 = vst [vmem:[%s1904_s21 + $0x68] sm:$0xff] %v1235_v48   ;;  %v1230_v62 = vpack.c.bf16 %v796_v25, %v795_v2  ;;  %v1508_v1 = vpop.eup %1507  ;;  %v735_v17 = vadd.f32 1.0, %v1506_v50 }
 0x139   : > { %1250 = vst [vmem:[%s1904_s21 + $0x20] sm:$0xff] %v1190_v6   ;;  %v1510_v0 = vpop.eup %1509  ;;  %1519 = vrcp.f32 %v719_v53  ;;  %v722_v42 = vadd.f32 1.0, %v1508_v1 }
 0x13a   : > { %1258 = vst [vmem:[%s1904_s21 + $0x60] sm:$0xff] %v1230_v62   ;;  %v1512_v54 = vpop.eup %1511  ;;  %1521 = vrcp.f32 %v735_v17  ;;  %v738_v4 = vadd.f32 1.0, %v1510_v0 }
 0x13b   : > { %v1514_v12 = vpop.eup %1513  ;;  %1523 = vrcp.f32 %v722_v42  ;;  %v720_v46 = vadd.f32 1.0, %v1512_v54 }
 0x13c   : > { %1525 = vrcp.f32 %v738_v4  ;;  %v736_v14 = vadd.f32 1.0, %v1514_v12  ;;  %v1516_v22 = vpop.eup %1515 }
 0x13d   : > { %1527 = vrcp.f32 %v720_v46  ;;  %v785_v33 = vmul.f32 %v1516_v22, %v1893_v9 }
 0x13e   : > { %1529 = vrcp.f32 %v736_v14 }
 0x13f   : > { %v1518_v15 = vpop.eup %1517 }
 0x140   : > { %v801_v40 = vmul.f32 %v1518_v15, %v1917_v8 }
 0x143   : > { %v1520_v24 = vpop.eup %1519 }
 0x144   : > { %v1522_v26 = vpop.eup %1521  ;;  %v783_v21 = vmul.f32 %v1520_v24, %v1929_v59 }
 0x145   : > { %v1524_v27 = vpop.eup %1523 }
 0x146   : > { %v1526_v30 = vpop.eup %1525  ;;  %v786_v35 = vmul.f32 %v1524_v27, %v1938_v38  ;;  %v799_v38 = vmul.f32 %v1522_v26, %v1935_v55 }
 0x147   : > { %v1528_v10 = vpop.eup %1527  ;;  %v802_v28 = vmul.f32 %v1526_v30, %v1943_v13 }
 0x148   : > { %v1530_v34 = vpop.eup %1529  ;;  %v1205_v41 = vpack.c.bf16 %v786_v35, %v785_v33  ;;  %v784_v9 = vmul.f32 %v1528_v10, %v1947_v51 }
 0x149   : > { %v1245_v37 = vpack.c.bf16 %v802_v28, %v801_v40  ;;  %v800_v23 = vmul.f32 %v1530_v34, %v1952_v39 }
 0x14a   : > { %1253 = vst [vmem:[%s1904_s21 + $0x38] sm:$0xff] %v1205_v41   ;;  %v1200_v8 = vpack.c.bf16 %v784_v9, %v783_v21 }
 0x14b   : > { %1261 = vst [vmem:[%s1904_s21 + $0x78] sm:$0xff] %v1245_v37   ;;  %v1240_v59 = vpack.c.bf16 %v800_v23, %v799_v38 }
 0x14c   : > { %1252 = vst [vmem:[%s1904_s21 + $0x30] sm:$0xff] %v1200_v8  }
 0x14d   : > { %1260 = vst [vmem:[%s1904_s21 + $0x70] sm:$0xff] %v1240_v59  }
 0x14e   : > { %1544 = shalt.err (!%p1541_p5)
}
 0x14f   : > { %s1545_s7 = scalar_lea.hbm %s1997_s15, 2048  ;;  %s1549_s10 = scalar_lea.hbm %s2055_s3, 4096 }
 0x150   : > { %p1546_p6 = scmp.ne.s32.totalorder %s1997_s15, %s1545_s7  ;;  %p1550_p10 = scmp.lt.u32.totalorder %s1997_s15, %s2055_s3 }
 0x151   : > { %p1551_p11 = scmp.lt.u32.totalorder %s1549_s10, %s1545_s7  ;;  %p1553_p13 = scmp.lt.u32.totalorder %s1545_s7, %s1997_s15 }
 0x152   : > { %p1547_p7 = pnand %p1546_p6, %p1674_p4 }
 0x153   : > { %p1552_p12 = por %p1551_p11, %p1550_p10 }
 0x154   : > { %p1548_p9 = pneg %p1547_p7 }
 0x155   : > { %p1554_p0 = por %p1553_p13, %p1552_p12 }
 0x157   : > { %p1555_p1 = pnand %p1554_p0, %p1548_p9 }
 0x159   : > { %1558 = shalt.err (!%p1555_p1)
}
 0x15a   : > { %s1612_s19 = smov 64   ;;  %s1613_s21 = smov 4  }
 0x15b   : > { %1327 = dma.vmem_to_hbm [thread:$0]  (%p1674_p4), %s1999_s26, 2048, %s1997_s15, %s2006_s29, %s1612_s19, %s1612_s19, %s1613_s21  }
 0x15c PF: > { %p1333_p2 = scmp.ge.s32.totalorder %s1609_s17, 2  ;;  %s993_s23 = sand.u32 1, %s1589_s12  }
 0x15d   : > { %s994_s27 = scalar_lea.sflag [#allocation3], %s993_s23 }
 0x15e   : > { %p1330_p3 = pnand %p1333_p2, %p1681_p8 }
 0x160   : > { %1584 = dma.done.wait (!%p1330_p3), %s994_s27, 2048  }
 0x161   : > { %1586 = vsyncadd (!%p1330_p3), %s994_s27, 4294965248  ;;  %s16_s17 = sadd.s32 1, %s1609_s17   ;;  %s2058_s12 = smov %s1593_s13 }
 0x162   : > { %p13_p5 = scmp.ge.s32.totalorder %s16_s17, 4   ;;  %s2059_s13 = smov %s1597_s14 }
 0x163   : > { %s2060_s14 = smov %s1687_s25  ;;  %s2061_s15 = smov %s1605_s16 }
 0x164   : > { %s2062_s16 = smov %s2064_s20  ;;  %15 = sbr.rel (!%p13_p5) target bundleno = 4 (0x4), region = 69 }
 0x16b   :  { %999 = vsyncpa [#allocation3], 1 }
 0x16c   :  { %1001 = vsyncpa [#allocation3 + $0x1], 1 }

</bundles_post_ra>
